<compile_context>
chip_gen: v5e
topology: v5e:2x2
jax: 0.10.0
libtpu: 0.0.40
codegen_flags: <defaults>
</compile_context>

<pallas_src>
import functools

import jax
import jax.numpy as jnp
from jax import lax
from jax.experimental import pallas as pl
from jax.experimental.pallas import tpu as pltpu


_COMPUTE_DTYPE = jnp.bfloat16     # MXU operands; stats/accumulators stay f32
_MASK_VALUE = -1e30               # large-negative causal mask (avoids inf-inf)
_VMEM_LIMIT = 32 * 1024 * 1024    # safe on v5e/v6e/v7x for the tiles below


# ----------------------------------------------------------------------------
# small helpers
# ----------------------------------------------------------------------------
def _pick_tile(dim, desired, align):
    """Largest tile <= desired that divides `dim` and is `align`-aligned,
    falling back to the full dimension (always legal)."""
    if dim <= desired:
        return dim
    t = (desired // align) * align
    while t >= align:
        if dim % t == 0:
            return t
        t -= align
    return dim


def _pick_head_block(h_total, d_head, max_lanes=512):
    """Heads per QKV weight/output block. hb*d_head must be a multiple of 128
    (or the full lane extent) so the weight block stays lane-legal and the
    single wide dot keeps the MXU occupied."""
    if h_total * d_head <= max_lanes:
        return h_total
    for hb in range(h_total, 0, -1):
        if (h_total % hb == 0 and (hb * d_head) % 128 == 0
                and hb * d_head <= max_lanes):
            return hb
    return h_total


def _rotate_half(y):
    """Returns [x2, x1]; the sign is pre-folded into the signed sin table."""
    d = y.shape[-1]
    half = d // 2
    if d % 128 == 0:
        # lane-aligned: XLU rotate co-issues with VPU/MXU work
        return pltpu.roll(y, shift=half, axis=-1)
    # small / unaligned head dim: safe fallback
    return jnp.concatenate([y[..., half:], y[..., :half]], axis=-1)


# ----------------------------------------------------------------------------
# Kernel 1: fused QKV projection + RoPE + q-scaling, head-major output
# ----------------------------------------------------------------------------
def _qkv_proj_kernel(x_ref, w_ref, cos_ref, sin_ref, out_ref, acc_ref, *,
                     hb, d_head, n_q_heads, n_rope_heads, scale):
    # all program ids at top level (never inside pl.when closures)
    hi = pl.program_id(0)
    ki = pl.program_id(2)
    nk = pl.num_programs(2)

    @pl.when(ki == 0)
    def _():
        acc_ref[...] = jnp.zeros(acc_ref.shape, acc_ref.dtype)

    # single MXU-wide dot: (tm, tk) x (tk, hb*D) -> (tm, hb*D)
    acc_ref[...] += jnp.dot(x_ref[...], w_ref[...],
                            preferred_element_type=jnp.float32)

    @pl.when(ki == nk - 1)
    def _():
        cos = cos_ref[...]                      # (tm, D) f32
        sin_s = sin_ref[...]                    # sign-folded sin, f32
        for j in range(hb):                     # per-head finalize (cheap)
            head = hi * hb + j                  # traced scalar
            y = acc_ref[:, j * d_head:(j + 1) * d_head]
            roped = y * cos + _rotate_half(y) * sin_s
            y = jnp.where(head < n_rope_heads, roped, y)   # rope only q & k
            y = jnp.where(head < n_q_heads, y * scale, y)  # fold 1/sqrt(d) in q
            out_ref[j] = y.astype(out_ref.dtype)


def fused_qkv_rope_proj(x2, w_qkv, cos, sin_signed, *, S, n_q_heads,
                        n_kv_heads, d_head, scale):
    M, K = x2.shape
    _, N = w_qkv.shape
    h_total = n_q_heads + 2 * n_kv_heads
    assert N == h_total * d_head

    tm = _pick_tile(S, 512, 16)          # seq-aligned so RoPE rows line up
    tk = _pick_tile(K, 512, 128)
    hb = _pick_head_block(h_total, d_head)
    n_s_tiles = S // tm

    kernel = functools.partial(
        _qkv_proj_kernel, hb=hb, d_head=d_head, n_q_heads=n_q_heads,
        n_rope_heads=n_q_heads + n_kv_heads, scale=scale)

    flops = 2 * M * K * N
    bytes_accessed = 2 * (M * K + K * N + M * N) + 8 * S * d_head

    return pl.pallas_call(
        kernel,
        out_shape=jax.ShapeDtypeStruct((h_total, M, d_head), _COMPUTE_DTYPE),
        grid=(h_total // hb, M // tm, K // tk),
        in_specs=[
            pl.BlockSpec((tm, tk), lambda hi, mi, ki: (mi, ki)),
            pl.BlockSpec((tk, hb * d_head), lambda hi, mi, ki: (ki, hi)),
            pl.BlockSpec((tm, d_head), lambda hi, mi, ki: (mi % n_s_tiles, 0)),
            pl.BlockSpec((tm, d_head), lambda hi, mi, ki: (mi % n_s_tiles, 0)),
        ],
        out_specs=pl.BlockSpec((hb, tm, d_head), lambda hi, mi, ki: (hi, mi, 0)),
        scratch_shapes=[pltpu.VMEM((tm, hb * d_head), jnp.float32)],
        compiler_params=pltpu.CompilerParams(
            dimension_semantics=("parallel", "parallel", "arbitrary"),
            vmem_limit_bytes=_VMEM_LIMIT),
        cost_estimate=pl.CostEstimate(
            flops=int(flops), transcendentals=0,
            bytes_accessed=int(bytes_accessed)),
    )(x2, w_qkv, cos, sin_signed)


# ----------------------------------------------------------------------------
# Kernel 2: causal flash attention, GQA group folded per kv head
# ----------------------------------------------------------------------------
def _flash_attn_kernel(q_ref, k_ref, v_ref, o_ref, m_ref, l_ref, acc_ref, *,
                       tq, tkv, group):
    # program ids only at top level
    qi = pl.program_id(2)
    ki = pl.program_id(3)
    nkv = pl.num_programs(3)
    d = q_ref.shape[-1]

    last_needed = (qi * tq + tq - 1) // tkv          # last kv tile touching diag
    full_tile = ki * tkv + tkv <= qi * tq + 1        # entirely below diagonal
    diag_tile = jnp.logical_and(ki <= last_needed, jnp.logical_not(full_tile))

    @pl.when(ki == 0)
    def _():
        m_ref[...] = jnp.full(m_ref.shape, _MASK_VALUE, m_ref.dtype)
        l_ref[...] = jnp.zeros(l_ref.shape, l_ref.dtype)
        acc_ref[...] = jnp.zeros(acc_ref.shape, acc_ref.dtype)

    def scores():
        q = q_ref[...].reshape(group * tq, d)        # q pre-roped & pre-scaled
        k = k_ref[0]                                 # (tkv, D)
        return lax.dot_general(q, k, (((1,), (1,)), ((), ())),
                               preferred_element_type=jnp.float32)

    def online_update(s):
        m_prev = m_ref[...]
        m_new = jnp.maximum(m_prev, jnp.max(s, axis=-1, keepdims=True))
        alpha = jnp.exp(m_prev - m_new)
        p = jnp.exp(s - m_new)
        l_ref[...] = alpha * l_ref[...] + jnp.sum(p, axis=-1, keepdims=True)
        acc_ref[...] = alpha * acc_ref[...] + jnp.dot(
            p.astype(v_ref.dtype), v_ref[0], preferred_element_type=jnp.float32)
        m_ref[...] = m_new

    @pl.when(full_tile)                 # interior tile: no causal mask work
    def _():
        online_update(scores())

    @pl.when(diag_tile)                 # diagonal-straddling tile: apply mask
    def _():
        s = scores()
        rows = qi * tq + lax.broadcasted_iota(jnp.int32, (tq, tkv), 0)
        cols = ki * tkv + lax.broadcasted_iota(jnp.int32, (tq, tkv), 1)
        keep = cols <= rows
        s = jnp.where(keep[None, :, :], s.reshape(group, tq, tkv), _MASK_VALUE)
        online_update(s.reshape(group * tq, tkv))

    @pl.when(ki == nkv - 1)
    def _():
        out = acc_ref[...] / l_ref[...]              # exact normalize
        o_ref[...] = out.reshape(group, tq, d).astype(o_ref.dtype)


def flash_gqa_attention(qkv, *, B, S, n_q_heads, n_kv_heads, d_head):
    h_total, M, D = qkv.shape
    Hq, Hkv = n_q_heads, n_kv_heads
    assert Hq % Hkv == 0 and D == d_head and M == B * S
    group = Hq // Hkv

    tq = _pick_tile(S, max(128, 512 // group), 16)
    tkv = _pick_tile(S, 512, 16)
    nq = S // tq
    nkv = S // tkv

    def _kv_block(qi, ki):
        # clamp to last needed tile -> repeated block index -> no extra DMA
        return jnp.minimum(ki, (qi * tq + tq - 1) // tkv)

    q_map = lambda b, h, qi, ki: (h, b * nq + qi, 0)            # heads [h*g, h*g+g)
    k_map = lambda b, h, qi, ki: (Hq + h, b * nkv + _kv_block(qi, ki), 0)
    v_map = lambda b, h, qi, ki: (Hq + Hkv + h, b * nkv + _kv_block(qi, ki), 0)
    o_map = lambda b, h, qi, ki: (h, b * nq + qi, 0)

    kernel = functools.partial(_flash_attn_kernel, tq=tq, tkv=tkv, group=group)

    flops = 2 * B * Hq * S * S * D                  # causal ~ half of dense
    transcend = (B * Hq * S * S) // 2
    kv_reads = 2 * (2 * Hkv * M * D) * max(1, (nq + 1) // 2)
    bytes_accessed = 2 * (2 * Hq * M * D) + kv_reads

    return pl.pallas_call(
        kernel,
        out_shape=jax.ShapeDtypeStruct((Hq, M, D), qkv.dtype),
        grid=(B, Hkv, nq, nkv),
        in_specs=[
            pl.BlockSpec((group, tq, D), q_map),
            pl.BlockSpec((1, tkv, D), k_map),
            pl.BlockSpec((1, tkv, D), v_map),
        ],
        out_specs=pl.BlockSpec((group, tq, D), o_map),
        scratch_shapes=[
            pltpu.VMEM((group * tq, 1), jnp.float32),     # running max
            pltpu.VMEM((group * tq, 1), jnp.float32),     # running sum
            pltpu.VMEM((group * tq, D), jnp.float32),     # output accumulator
        ],
        compiler_params=pltpu.CompilerParams(
            dimension_semantics=("parallel", "parallel", "parallel", "arbitrary"),
            vmem_limit_bytes=_VMEM_LIMIT),
        cost_estimate=pl.CostEstimate(
            flops=int(flops), transcendentals=int(transcend),
            bytes_accessed=int(bytes_accessed)),
    )(qkv, qkv, qkv)


# ----------------------------------------------------------------------------
# Kernel 3: output projection with the head reduction folded in-kernel
# ----------------------------------------------------------------------------
def _oproj_kernel(a_ref, w_ref, o_ref):
    n_heads = a_ref.shape[0]
    acc = jnp.zeros(o_ref.shape, jnp.float32)
    for h in range(n_heads):                         # unrolled head reduction
        acc = acc + jnp.dot(a_ref[h], w_ref[h],
                            preferred_element_type=jnp.float32)
    o_ref[...] = acc.astype(o_ref.dtype)


def output_proj(attn, wo_heads, out_dtype):
    Hq, M, D = attn.shape
    _, _, Dm = wo_heads.shape
    tm = _pick_tile(M, 512, 16)
    tn = _pick_tile(Dm, 512, 128)

    flops = 2 * M * Hq * D * Dm
    bytes_accessed = 2 * (Hq * M * D + Hq * D * Dm) + 4 * M * Dm

    return pl.pallas_call(
        _oproj_kernel,
        out_shape=jax.ShapeDtypeStruct((M, Dm), out_dtype),
        grid=(M // tm, Dm // tn),
        in_specs=[
            pl.BlockSpec((Hq, tm, D), lambda mi, ni: (0, mi, 0)),
            pl.BlockSpec((Hq, D, tn), lambda mi, ni: (0, 0, ni)),
        ],
        out_specs=pl.BlockSpec((tm, tn), lambda mi, ni: (mi, ni)),
        compiler_params=pltpu.CompilerParams(
            dimension_semantics=("parallel", "parallel"),
            vmem_limit_bytes=_VMEM_LIMIT),
        cost_estimate=pl.CostEstimate(
            flops=int(flops), transcendentals=0,
            bytes_accessed=int(bytes_accessed)),
    )(attn, wo_heads)


# ----------------------------------------------------------------------------
# Full forward pass
# ----------------------------------------------------------------------------
def gqa_forward(x, cos, sin, wq, wk, wv, wo, *, n_attn_heads, n_kv_heads, d_head):
    B, S, Dm = x.shape
    Hq, Hkv, D = n_attn_heads, n_kv_heads, d_head
    M = B * S
    scale = float(D) ** -0.5

    # one-time parameter / table prep (weights would normally be stored
    # pre-transposed; this sits outside the per-token hot path)
    w_qkv = jnp.concatenate([wq, wk, wv], axis=0).T.astype(_COMPUTE_DTYPE)  # (Dm, Htot*D)
    wo_heads = wo.T.reshape(Hq, D, Dm).astype(_COMPUTE_DTYPE)               # (Hq, D, Dm)

    sign = jnp.concatenate([-jnp.ones((D // 2,), jnp.float32),
                            jnp.ones((D // 2,), jnp.float32)])
    cos_f32 = cos.astype(jnp.float32)
    sin_signed = sin.astype(jnp.float32) * sign[None, :]    # sign-folded sin

    x2 = x.reshape(M, Dm).astype(_COMPUTE_DTYPE)

    # 1) fused q/k/v projection with RoPE + q-scale folded in -> (Htot, M, D)
    qkv = fused_qkv_rope_proj(x2, w_qkv, cos_f32, sin_signed, S=S,
                              n_q_heads=Hq, n_kv_heads=Hkv, d_head=D,
                              scale=scale)
    # 2) causal flash attention with GQA group folding -> (Hq, M, D)
    attn = flash_gqa_attention(qkv, B=B, S=S, n_q_heads=Hq, n_kv_heads=Hkv,
                               d_head=D)
    # 3) output projection (head reduction folded in-kernel) -> (M, Dm)
    out = output_proj(attn, wo_heads, x.dtype)
    return out.reshape(B, S, Dm)


# ----------------------------------------------------------------------------
# Pure-JAX reference (mirrors the PyTorch forward)
# ----------------------------------------------------------------------------
def _rotate_half_ref(x):
    half = x.shape[-1] // 2
    return jnp.concatenate([-x[..., half:], x[..., :half]], axis=-1)


def gqa_forward_ref(x, cos, sin, wq, wk, wv, wo, *, n_attn_heads, n_kv_heads, d_head):
    B, S, _ = x.shape
    q = (x @ wq.T).reshape(B, S, n_attn_heads, d_head).transpose(0, 2, 1, 3)
    k = (x @ wk.T).reshape(B, S, n_kv_heads, d_head).transpose(0, 2, 1, 3)
    v = (x @ wv.T).reshape(B, S, n_kv_heads, d_head).transpose(0, 2, 1, 3)

    q = q * cos + _rotate_half_ref(q) * sin
    k = k * cos + _rotate_half_ref(k) * sin

    group = n_attn_heads // n_kv_heads
    k = jnp.repeat(k, group, axis=1)
    v = jnp.repeat(v, group, axis=1)

    s = jnp.einsum("bhqd,bhkd->bhqk", q, k) * (float(d_head) ** -0.5)
    mask = jnp.tril(jnp.ones((S, S), dtype=bool))
    s = jnp.where(mask, s, -jnp.inf)
    attn = jax.nn.softmax(s, axis=-1)
    out = jnp.einsum("bhqk,bhkd->bhqd", attn, v)
    out = out.transpose(0, 2, 1, 3).reshape(B, S, n_attn_heads * d_head)
    return out @ wo.T


# ----------------------------------------------------------------------------
if __name__ == "__main__":
    # small config: d_model = n_attn_heads * d_head
    B, S = 2, 8
    d_model, n_attn_heads, n_kv_heads, d_head = 32, 4, 2, 8

    key = jax.random.PRNGKey(0)
    kx, kq, kk, kv, ko = jax.random.split(key, 5)

    x = jax.random.normal(kx, (B, S, d_model), dtype=jnp.float32)
    wq = 0.02 * jax.random.normal(kq, (n_attn_heads * d_head, d_model), dtype=jnp.float32)
    wk = 0.02 * jax.random.normal(kk, (n_kv_heads * d_head, d_model), dtype=jnp.float32)
    wv = 0.02 * jax.random.normal(kv, (n_kv_heads * d_head, d_model), dtype=jnp.float32)
    wo = 0.02 * jax.random.normal(ko, (d_model, d_model), dtype=jnp.float32)

    # RoPE cos/sin tables, shape (S, d_head)
    pos = jnp.arange(S, dtype=jnp.float32)
    inv_freq = 1.0 / (10000.0 ** (jnp.arange(0, d_head, 2, dtype=jnp.float32) / d_head))
    freqs = pos[:, None] * inv_freq[None, :]
    emb = jnp.concatenate([freqs, freqs], axis=-1)
    cos, sin = jnp.cos(emb), jnp.sin(emb)

    out = gqa_forward(
        x, cos, sin, wq, wk, wv, wo,
        n_attn_heads=n_attn_heads, n_kv_heads=n_kv_heads, d_head=d_head,
    )
    out = jax.block_until_ready(out)

    ref = gqa_forward_ref(
        x, cos, sin, wq, wk, wv, wo,
        n_attn_heads=n_attn_heads, n_kv_heads=n_kv_heads, d_head=d_head,
    )
    assert out.shape == (B, S, d_model)
    max_err = float(jnp.max(jnp.abs(out.astype(jnp.float32) - ref)))
    # bf16 MXU operands => looser tolerance than pure f32
    assert max_err < 2e-2, max_err

    print("KERNEL_OK")
</pallas_src>

<mosaic_0001>
module attributes {stable_mosaic.version = 11 : i64} {
  func.func @_qkv_proj_kernel(%arg0: i32, %arg1: i32, %arg2: i32, %arg3: memref<8x32xbf16, #tpu.memory_space<vmem>>, %arg4: memref<32x64xbf16, #tpu.memory_space<vmem>>, %arg5: memref<8x8xf32, #tpu.memory_space<vmem>>, %arg6: memref<8x8xf32, #tpu.memory_space<vmem>>, %arg7: memref<8x8x8xbf16, #tpu.memory_space<vmem>>, %arg8: memref<8x64xf32, #tpu.memory_space<vmem>>) attributes {dimension_semantics = [#tpu.dimension_semantics<parallel>, #tpu.dimension_semantics<parallel>, #tpu.dimension_semantics<arbitrary>], iteration_bounds = array<i64: 1, 2, 1>, scalar_prefetch = 0 : i64, scratch_operands = 1 : i64, tpu.core_type = #tpu.core_type<tc>, window_params = [{transform_indices = @transform_0, window_bounds = array<i64: 8, 32>}, {transform_indices = @transform_1, window_bounds = array<i64: 32, 64>}, {transform_indices = @transform_2, window_bounds = array<i64: 8, 8>}, {transform_indices = @transform_3, window_bounds = array<i64: 8, 8>}, {transform_indices = @transform_4, window_bounds = array<i64: 8, 8, 8>}]} {
    %c0_i32 = arith.constant 0 : i32
    %0 = arith.cmpi eq, %arg2, %c0_i32 : i32
    %1 = arith.extui %0 : i1 to i32
    %c0_i32_0 = arith.constant 0 : i32
    %2 = arith.cmpi ne, %1, %c0_i32_0 : i32
    scf.if %2 {
      %cst_10 = arith.constant 0.000000e+00 : f32
      %12 = vector.broadcast %cst_10 : f32 to vector<8x64xf32>
      %c0_11 = arith.constant 0 : index
      %c0_12 = arith.constant 0 : index
      %13 = vector.load %arg8[%c0_11, %c0_12] : memref<8x64xf32, #tpu.memory_space<vmem>>, vector<8x64xf32>
      tpu.vector_store %arg8[%c0_11, %c0_12], %12 {strides = array<i32>} : memref<8x64xf32, #tpu.memory_space<vmem>>, vector<8x64xf32>,
    } else {
    }
    %c0 = arith.constant 0 : index
    %c0_1 = arith.constant 0 : index
    %3 = vector.load %arg8[%c0, %c0_1] : memref<8x64xf32, #tpu.memory_space<vmem>>, vector<8x64xf32>
    %c0_2 = arith.constant 0 : index
    %c0_3 = arith.constant 0 : index
    %4 = vector.load %arg3[%c0_2, %c0_3] : memref<8x32xbf16, #tpu.memory_space<vmem>>, vector<8x32xbf16>
    %c0_4 = arith.constant 0 : index
    %c0_5 = arith.constant 0 : index
    %5 = vector.load %arg4[%c0_4, %c0_5] : memref<32x64xbf16, #tpu.memory_space<vmem>>, vector<32x64xbf16>
    %cst = arith.constant dense<0.000000e+00> : vector<8x64xf32>
    %6 = tpu.matmul %4, %5, %cst {dimension_numbers = #tpu.dot_dimension_numbers<[1], [0], [0], [1], [0, 0, 1, 1], [], []>} : vector<8x32xbf16>, vector<32x64xbf16>, vector<8x64xf32> -> vector<8x64xf32>
    %7 = arith.addf %3, %6 : vector<8x64xf32>
    %c0_6 = arith.constant 0 : index
    %c0_7 = arith.constant 0 : index
    %8 = vector.load %arg8[%c0_6, %c0_7] : memref<8x64xf32, #tpu.memory_space<vmem>>, vector<8x64xf32>
    tpu.vector_store %arg8[%c0_6, %c0_7], %7 {strides = array<i32>} : memref<8x64xf32, #tpu.memory_space<vmem>>, vector<8x64xf32>,
    %c0_i32_8 = arith.constant 0 : i32
    %9 = arith.cmpi eq, %arg2, %c0_i32_8 : i32
    %10 = arith.extui %9 : i1 to i32
    %c0_i32_9 = arith.constant 0 : i32
    %11 = arith.cmpi ne, %10, %c0_i32_9 : i32
    scf.if %11 {
      %c0_10 = arith.constant 0 : index
      %c0_11 = arith.constant 0 : index
      %12 = vector.load %arg5[%c0_10, %c0_11] : memref<8x8xf32, #tpu.memory_space<vmem>>, vector<8x8xf32>
      %c0_12 = arith.constant 0 : index
      %c0_13 = arith.constant 0 : index
      %13 = vector.load %arg6[%c0_12, %c0_13] : memref<8x8xf32, #tpu.memory_space<vmem>>, vector<8x8xf32>
      %c8_i32 = arith.constant 8 : i32
      %14 = arith.muli %arg0, %c8_i32 : i32
      %c0_i32_14 = arith.constant 0 : i32
      %15 = arith.addi %14, %c0_i32_14 : i32
      %c0_15 = arith.constant 0 : index
      %c0_16 = arith.constant 0 : index
      %16 = vector.load %arg8[%c0_15, %c0_16] : memref<8x64xf32, #tpu.memory_space<vmem>>, vector<8x8xf32>
      %17 = arith.mulf %16, %12 : vector<8x8xf32>
      %18 = vector.extract_strided_slice %16 {offsets = [0, 4], sizes = [8, 4], strides = [1, 1]} : vector<8x8xf32> to vector<8x4xf32>
      %19 = vector.extract_strided_slice %16 {offsets = [0, 0], sizes = [8, 4], strides = [1, 1]} : vector<8x8xf32> to vector<8x4xf32>
      %20 = tpu.concatenate %18, %19 in 1 : vector<8x4xf32>, vector<8x4xf32> -> vector<8x8xf32>
      %21 = arith.mulf %20, %13 : vector<8x8xf32>
      %22 = arith.addf %17, %21 : vector<8x8xf32>
      %c6_i32 = arith.constant 6 : i32
      %23 = arith.cmpi slt, %15, %c6_i32 : i32
      %24 = arith.select %23, %22, %16 : vector<8x8xf32>
      %c4_i32 = arith.constant 4 : i32
      %25 = arith.cmpi slt, %15, %c4_i32 : i32
      %cst_17 = arith.constant 0.353553385 : f32
      %26 = vector.broadcast %cst_17 : f32 to vector<8x8xf32>
      %27 = arith.mulf %24, %26 : vector<8x8xf32>
      %28 = arith.select %25, %27, %24 : vector<8x8xf32>
      %29 = arith.truncf %28 : vector<8x8xf32> to vector<8x8xbf16>
      %c0_18 = arith.constant 0 : index
      %c0_19 = arith.constant 0 : index
      %c0_20 = arith.constant 0 : index
      %30 = vector.load %arg7[%c0_18, %c0_19, %c0_20] : memref<8x8x8xbf16, #tpu.memory_space<vmem>>, vector<1x8x8xbf16>
      %31 = vector.shape_cast %30 : vector<1x8x8xbf16> to vector<8x8xbf16>
      %32 = vector.shape_cast %29 : vector<8x8xbf16> to vector<1x8x8xbf16>
      tpu.vector_store %arg7[%c0_18, %c0_19, %c0_20], %32 {strides = array<i32>} : memref<8x8x8xbf16, #tpu.memory_space<vmem>>, vector<1x8x8xbf16>,
      %c8_i32_21 = arith.constant 8 : i32
      %33 = arith.muli %arg0, %c8_i32_21 : i32
      %c1_i32 = arith.constant 1 : i32
      %34 = arith.addi %33, %c1_i32 : i32
      %c0_22 = arith.constant 0 : index
      %c8 = arith.constant 8 : index
      %35 = vector.load %arg8[%c0_22, %c8] : memref<8x64xf32, #tpu.memory_space<vmem>>, vector<8x8xf32>
      %36 = arith.mulf %35, %12 : vector<8x8xf32>
      %37 = vector.extract_strided_slice %35 {offsets = [0, 4], sizes = [8, 4], strides = [1, 1]} : vector<8x8xf32> to vector<8x4xf32>
      %38 = vector.extract_strided_slice %35 {offsets = [0, 0], sizes = [8, 4], strides = [1, 1]} : vector<8x8xf32> to vector<8x4xf32>
      %39 = tpu.concatenate %37, %38 in 1 : vector<8x4xf32>, vector<8x4xf32> -> vector<8x8xf32>
      %40 = arith.mulf %39, %13 : vector<8x8xf32>
      %41 = arith.addf %36, %40 : vector<8x8xf32>
      %c6_i32_23 = arith.constant 6 : i32
      %42 = arith.cmpi slt, %34, %c6_i32_23 : i32
      %43 = arith.select %42, %41, %35 : vector<8x8xf32>
      %c4_i32_24 = arith.constant 4 : i32
      %44 = arith.cmpi slt, %34, %c4_i32_24 : i32
      %cst_25 = arith.constant 0.353553385 : f32
      %45 = vector.broadcast %cst_25 : f32 to vector<8x8xf32>
      %46 = arith.mulf %43, %45 : vector<8x8xf32>
      %47 = arith.select %44, %46, %43 : vector<8x8xf32>
      %48 = arith.truncf %47 : vector<8x8xf32> to vector<8x8xbf16>
      %c1 = arith.constant 1 : index
      %c0_26 = arith.constant 0 : index
      %c0_27 = arith.constant 0 : index
      %49 = vector.load %arg7[%c1, %c0_26, %c0_27] : memref<8x8x8xbf16, #tpu.memory_space<vmem>>, vector<1x8x8xbf16>
      %50 = vector.shape_cast %49 : vector<1x8x8xbf16> to vector<8x8xbf16>
      %51 = vector.shape_cast %48 : vector<8x8xbf16> to vector<1x8x8xbf16>
      tpu.vector_store %arg7[%c1, %c0_26, %c0_27], %51 {strides = array<i32>} : memref<8x8x8xbf16, #tpu.memory_space<vmem>>, vector<1x8x8xbf16>,
      %c8_i32_28 = arith.constant 8 : i32
      %52 = arith.muli %arg0, %c8_i32_28 : i32
      %c2_i32 = arith.constant 2 : i32
      %53 = arith.addi %52, %c2_i32 : i32
      %c0_29 = arith.constant 0 : index
      %c16 = arith.constant 16 : index
      %54 = vector.load %arg8[%c0_29, %c16] : memref<8x64xf32, #tpu.memory_space<vmem>>, vector<8x8xf32>
      %55 = arith.mulf %54, %12 : vector<8x8xf32>
      %56 = vector.extract_strided_slice %54 {offsets = [0, 4], sizes = [8, 4], strides = [1, 1]} : vector<8x8xf32> to vector<8x4xf32>
      %57 = vector.extract_strided_slice %54 {offsets = [0, 0], sizes = [8, 4], strides = [1, 1]} : vector<8x8xf32> to vector<8x4xf32>
      %58 = tpu.concatenate %56, %57 in 1 : vector<8x4xf32>, vector<8x4xf32> -> vector<8x8xf32>
      %59 = arith.mulf %58, %13 : vector<8x8xf32>
      %60 = arith.addf %55, %59 : vector<8x8xf32>
      %c6_i32_30 = arith.constant 6 : i32
      %61 = arith.cmpi slt, %53, %c6_i32_30 : i32
      %62 = arith.select %61, %60, %54 : vector<8x8xf32>
      %c4_i32_31 = arith.constant 4 : i32
      %63 = arith.cmpi slt, %53, %c4_i32_31 : i32
      %cst_32 = arith.constant 0.353553385 : f32
      %64 = vector.broadcast %cst_32 : f32 to vector<8x8xf32>
      %65 = arith.mulf %62, %64 : vector<8x8xf32>
      %66 = arith.select %63, %65, %62 : vector<8x8xf32>
      %67 = arith.truncf %66 : vector<8x8xf32> to vector<8x8xbf16>
      %c2 = arith.constant 2 : index
      %c0_33 = arith.constant 0 : index
      %c0_34 = arith.constant 0 : index
      %68 = vector.load %arg7[%c2, %c0_33, %c0_34] : memref<8x8x8xbf16, #tpu.memory_space<vmem>>, vector<1x8x8xbf16>
      %69 = vector.shape_cast %68 : vector<1x8x8xbf16> to vector<8x8xbf16>
      %70 = vector.shape_cast %67 : vector<8x8xbf16> to vector<1x8x8xbf16>
      tpu.vector_store %arg7[%c2, %c0_33, %c0_34], %70 {strides = array<i32>} : memref<8x8x8xbf16, #tpu.memory_space<vmem>>, vector<1x8x8xbf16>,
      %c8_i32_35 = arith.constant 8 : i32
      %71 = arith.muli %arg0, %c8_i32_35 : i32
      %c3_i32 = arith.constant 3 : i32
      %72 = arith.addi %71, %c3_i32 : i32
      %c0_36 = arith.constant 0 : index
      %c24 = arith.constant 24 : index
      %73 = vector.load %arg8[%c0_36, %c24] : memref<8x64xf32, #tpu.memory_space<vmem>>, vector<8x8xf32>
      %74 = arith.mulf %73, %12 : vector<8x8xf32>
      %75 = vector.extract_strided_slice %73 {offsets = [0, 4], sizes = [8, 4], strides = [1, 1]} : vector<8x8xf32> to vector<8x4xf32>
      %76 = vector.extract_strided_slice %73 {offsets = [0, 0], sizes = [8, 4], strides = [1, 1]} : vector<8x8xf32> to vector<8x4xf32>
      %77 = tpu.concatenate %75, %76 in 1 : vector<8x4xf32>, vector<8x4xf32> -> vector<8x8xf32>
      %78 = arith.mulf %77, %13 : vector<8x8xf32>
      %79 = arith.addf %74, %78 : vector<8x8xf32>
      %c6_i32_37 = arith.constant 6 : i32
      %80 = arith.cmpi slt, %72, %c6_i32_37 : i32
      %81 = arith.select %80, %79, %73 : vector<8x8xf32>
      %c4_i32_38 = arith.constant 4 : i32
      %82 = arith.cmpi slt, %72, %c4_i32_38 : i32
      %cst_39 = arith.constant 0.353553385 : f32
      %83 = vector.broadcast %cst_39 : f32 to vector<8x8xf32>
      %84 = arith.mulf %81, %83 : vector<8x8xf32>
      %85 = arith.select %82, %84, %81 : vector<8x8xf32>
      %86 = arith.truncf %85 : vector<8x8xf32> to vector<8x8xbf16>
      %c3 = arith.constant 3 : index
      %c0_40 = arith.constant 0 : index
      %c0_41 = arith.constant 0 : index
      %87 = vector.load %arg7[%c3, %c0_40, %c0_41] : memref<8x8x8xbf16, #tpu.memory_space<vmem>>, vector<1x8x8xbf16>
      %88 = vector.shape_cast %87 : vector<1x8x8xbf16> to vector<8x8xbf16>
      %89 = vector.shape_cast %86 : vector<8x8xbf16> to vector<1x8x8xbf16>
      tpu.vector_store %arg7[%c3, %c0_40, %c0_41], %89 {strides = array<i32>} : memref<8x8x8xbf16, #tpu.memory_space<vmem>>, vector<1x8x8xbf16>,
      %c8_i32_42 = arith.constant 8 : i32
      %90 = arith.muli %arg0, %c8_i32_42 : i32
      %c4_i32_43 = arith.constant 4 : i32
      %91 = arith.addi %90, %c4_i32_43 : i32
      %c0_44 = arith.constant 0 : index
      %c32 = arith.constant 32 : index
      %92 = vector.load %arg8[%c0_44, %c32] : memref<8x64xf32, #tpu.memory_space<vmem>>, vector<8x8xf32>
      %93 = arith.mulf %92, %12 : vector<8x8xf32>
      %94 = vector.extract_strided_slice %92 {offsets = [0, 4], sizes = [8, 4], strides = [1, 1]} : vector<8x8xf32> to vector<8x4xf32>
      %95 = vector.extract_strided_slice %92 {offsets = [0, 0], sizes = [8, 4], strides = [1, 1]} : vector<8x8xf32> to vector<8x4xf32>
      %96 = tpu.concatenate %94, %95 in 1 : vector<8x4xf32>, vector<8x4xf32> -> vector<8x8xf32>
      %97 = arith.mulf %96, %13 : vector<8x8xf32>
      %98 = arith.addf %93, %97 : vector<8x8xf32>
      %c6_i32_45 = arith.constant 6 : i32
      %99 = arith.cmpi slt, %91, %c6_i32_45 : i32
      %100 = arith.select %99, %98, %92 : vector<8x8xf32>
      %c4_i32_46 = arith.constant 4 : i32
      %101 = arith.cmpi slt, %91, %c4_i32_46 : i32
      %cst_47 = arith.constant 0.353553385 : f32
      %102 = vector.broadcast %cst_47 : f32 to vector<8x8xf32>
      %103 = arith.mulf %100, %102 : vector<8x8xf32>
      %104 = arith.select %101, %103, %100 : vector<8x8xf32>
      %105 = arith.truncf %104 : vector<8x8xf32> to vector<8x8xbf16>
      %c4 = arith.constant 4 : index
      %c0_48 = arith.constant 0 : index
      %c0_49 = arith.constant 0 : index
      %106 = vector.load %arg7[%c4, %c0_48, %c0_49] : memref<8x8x8xbf16, #tpu.memory_space<vmem>>, vector<1x8x8xbf16>
      %107 = vector.shape_cast %106 : vector<1x8x8xbf16> to vector<8x8xbf16>
      %108 = vector.shape_cast %105 : vector<8x8xbf16> to vector<1x8x8xbf16>
      tpu.vector_store %arg7[%c4, %c0_48, %c0_49], %108 {strides = array<i32>} : memref<8x8x8xbf16, #tpu.memory_space<vmem>>, vector<1x8x8xbf16>,
      %c8_i32_50 = arith.constant 8 : i32
      %109 = arith.muli %arg0, %c8_i32_50 : i32
      %c5_i32 = arith.constant 5 : i32
      %110 = arith.addi %109, %c5_i32 : i32
      %c0_51 = arith.constant 0 : index
      %c40 = arith.constant 40 : index
      %111 = vector.load %arg8[%c0_51, %c40] : memref<8x64xf32, #tpu.memory_space<vmem>>, vector<8x8xf32>
      %112 = arith.mulf %111, %12 : vector<8x8xf32>
      %113 = vector.extract_strided_slice %111 {offsets = [0, 4], sizes = [8, 4], strides = [1, 1]} : vector<8x8xf32> to vector<8x4xf32>
      %114 = vector.extract_strided_slice %111 {offsets = [0, 0], sizes = [8, 4], strides = [1, 1]} : vector<8x8xf32> to vector<8x4xf32>
      %115 = tpu.concatenate %113, %114 in 1 : vector<8x4xf32>, vector<8x4xf32> -> vector<8x8xf32>
      %116 = arith.mulf %115, %13 : vector<8x8xf32>
      %117 = arith.addf %112, %116 : vector<8x8xf32>
      %c6_i32_52 = arith.constant 6 : i32
      %118 = arith.cmpi slt, %110, %c6_i32_52 : i32
      %119 = arith.select %118, %117, %111 : vector<8x8xf32>
      %c4_i32_53 = arith.constant 4 : i32
      %120 = arith.cmpi slt, %110, %c4_i32_53 : i32
      %cst_54 = arith.constant 0.353553385 : f32
      %121 = vector.broadcast %cst_54 : f32 to vector<8x8xf32>
      %122 = arith.mulf %119, %121 : vector<8x8xf32>
      %123 = arith.select %120, %122, %119 : vector<8x8xf32>
      %124 = arith.truncf %123 : vector<8x8xf32> to vector<8x8xbf16>
      %c5 = arith.constant 5 : index
      %c0_55 = arith.constant 0 : index
      %c0_56 = arith.constant 0 : index
      %125 = vector.load %arg7[%c5, %c0_55, %c0_56] : memref<8x8x8xbf16, #tpu.memory_space<vmem>>, vector<1x8x8xbf16>
      %126 = vector.shape_cast %125 : vector<1x8x8xbf16> to vector<8x8xbf16>
      %127 = vector.shape_cast %124 : vector<8x8xbf16> to vector<1x8x8xbf16>
      tpu.vector_store %arg7[%c5, %c0_55, %c0_56], %127 {strides = array<i32>} : memref<8x8x8xbf16, #tpu.memory_space<vmem>>, vector<1x8x8xbf16>,
      %c8_i32_57 = arith.constant 8 : i32
      %128 = arith.muli %arg0, %c8_i32_57 : i32
      %c6_i32_58 = arith.constant 6 : i32
      %129 = arith.addi %128, %c6_i32_58 : i32
      %c0_59 = arith.constant 0 : index
      %c48 = arith.constant 48 : index
      %130 = vector.load %arg8[%c0_59, %c48] : memref<8x64xf32, #tpu.memory_space<vmem>>, vector<8x8xf32>
      %131 = arith.mulf %130, %12 : vector<8x8xf32>
      %132 = vector.extract_strided_slice %130 {offsets = [0, 4], sizes = [8, 4], strides = [1, 1]} : vector<8x8xf32> to vector<8x4xf32>
      %133 = vector.extract_strided_slice %130 {offsets = [0, 0], sizes = [8, 4], strides = [1, 1]} : vector<8x8xf32> to vector<8x4xf32>
      %134 = tpu.concatenate %132, %133 in 1 : vector<8x4xf32>, vector<8x4xf32> -> vector<8x8xf32>
      %135 = arith.mulf %134, %13 : vector<8x8xf32>
      %136 = arith.addf %131, %135 : vector<8x8xf32>
      %c6_i32_60 = arith.constant 6 : i32
      %137 = arith.cmpi slt, %129, %c6_i32_60 : i32
      %138 = arith.select %137, %136, %130 : vector<8x8xf32>
      %c4_i32_61 = arith.constant 4 : i32
      %139 = arith.cmpi slt, %129, %c4_i32_61 : i32
      %cst_62 = arith.constant 0.353553385 : f32
      %140 = vector.broadcast %cst_62 : f32 to vector<8x8xf32>
      %141 = arith.mulf %138, %140 : vector<8x8xf32>
      %142 = arith.select %139, %141, %138 : vector<8x8xf32>
      %143 = arith.truncf %142 : vector<8x8xf32> to vector<8x8xbf16>
      %c6 = arith.constant 6 : index
      %c0_63 = arith.constant 0 : index
      %c0_64 = arith.constant 0 : index
      %144 = vector.load %arg7[%c6, %c0_63, %c0_64] : memref<8x8x8xbf16, #tpu.memory_space<vmem>>, vector<1x8x8xbf16>
      %145 = vector.shape_cast %144 : vector<1x8x8xbf16> to vector<8x8xbf16>
      %146 = vector.shape_cast %143 : vector<8x8xbf16> to vector<1x8x8xbf16>
      tpu.vector_store %arg7[%c6, %c0_63, %c0_64], %146 {strides = array<i32>} : memref<8x8x8xbf16, #tpu.memory_space<vmem>>, vector<1x8x8xbf16>,
      %c8_i32_65 = arith.constant 8 : i32
      %147 = arith.muli %arg0, %c8_i32_65 : i32
      %c7_i32 = arith.constant 7 : i32
      %148 = arith.addi %147, %c7_i32 : i32
      %c0_66 = arith.constant 0 : index
      %c56 = arith.constant 56 : index
      %149 = vector.load %arg8[%c0_66, %c56] : memref<8x64xf32, #tpu.memory_space<vmem>>, vector<8x8xf32>
      %150 = arith.mulf %149, %12 : vector<8x8xf32>
      %151 = vector.extract_strided_slice %149 {offsets = [0, 4], sizes = [8, 4], strides = [1, 1]} : vector<8x8xf32> to vector<8x4xf32>
      %152 = vector.extract_strided_slice %149 {offsets = [0, 0], sizes = [8, 4], strides = [1, 1]} : vector<8x8xf32> to vector<8x4xf32>
      %153 = tpu.concatenate %151, %152 in 1 : vector<8x4xf32>, vector<8x4xf32> -> vector<8x8xf32>
      %154 = arith.mulf %153, %13 : vector<8x8xf32>
      %155 = arith.addf %150, %154 : vector<8x8xf32>
      %c6_i32_67 = arith.constant 6 : i32
      %156 = arith.cmpi slt, %148, %c6_i32_67 : i32
      %157 = arith.select %156, %155, %149 : vector<8x8xf32>
      %c4_i32_68 = arith.constant 4 : i32
      %158 = arith.cmpi slt, %148, %c4_i32_68 : i32
      %cst_69 = arith.constant 0.353553385 : f32
      %159 = vector.broadcast %cst_69 : f32 to vector<8x8xf32>
      %160 = arith.mulf %157, %159 : vector<8x8xf32>
      %161 = arith.select %158, %160, %157 : vector<8x8xf32>
      %162 = arith.truncf %161 : vector<8x8xf32> to vector<8x8xbf16>
      %c7 = arith.constant 7 : index
      %c0_70 = arith.constant 0 : index
      %c0_71 = arith.constant 0 : index
      %163 = vector.load %arg7[%c7, %c0_70, %c0_71] : memref<8x8x8xbf16, #tpu.memory_space<vmem>>, vector<1x8x8xbf16>
      %164 = vector.shape_cast %163 : vector<1x8x8xbf16> to vector<8x8xbf16>
      %165 = vector.shape_cast %162 : vector<8x8xbf16> to vector<1x8x8xbf16>
      tpu.vector_store %arg7[%c7, %c0_70, %c0_71], %165 {strides = array<i32>} : memref<8x8x8xbf16, #tpu.memory_space<vmem>>, vector<1x8x8xbf16>,
    } else {
    }
    return
  }
  func.func @transform_0(%arg0: i32, %arg1: i32, %arg2: i32) -> (i32, i32) {
    %c0_i32 = arith.constant 0 : i32
    return %arg1, %arg2 : i32, i32
  }
  func.func @transform_1(%arg0: i32, %arg1: i32, %arg2: i32) -> (i32, i32) {
    %c0_i32 = arith.constant 0 : i32
    return %arg2, %arg0 : i32, i32
  }
  func.func @transform_2(%arg0: i32, %arg1: i32, %arg2: i32) -> (i32, i32) {
    %c1_i32 = arith.constant 1 : i32
    %c0_i32 = arith.constant 0 : i32
    %0 = arith.cmpi eq, %c1_i32, %c0_i32 : i32
    %c1_i32_0 = arith.constant 1 : i32
    %1 = arith.select %0, %c1_i32_0, %c1_i32 : i32
    %2 = arith.remsi %arg1, %1 : i32
    %c0_i32_1 = arith.constant 0 : i32
    %3 = arith.cmpi ne, %2, %c0_i32_1 : i32
    %c0_i32_2 = arith.constant 0 : i32
    %4 = arith.cmpi slt, %2, %c0_i32_2 : i32
    %c0_i32_3 = arith.constant 0 : i32
    %5 = arith.cmpi slt, %1, %c0_i32_3 : i32
    %6 = arith.xori %4, %5 : i1
    %7 = arith.andi %6, %3 : i1
    %8 = arith.addi %2, %1 : i32
    %9 = arith.select %7, %8, %2 : i32
    %c0_i32_4 = arith.constant 0 : i32
    %c0_i32_5 = arith.constant 0 : i32
    return %9, %c0_i32_4 : i32, i32
  }
  func.func @transform_3(%arg0: i32, %arg1: i32, %arg2: i32) -> (i32, i32) {
    %c1_i32 = arith.constant 1 : i32
    %c0_i32 = arith.constant 0 : i32
    %0 = arith.cmpi eq, %c1_i32, %c0_i32 : i32
    %c1_i32_0 = arith.constant 1 : i32
    %1 = arith.select %0, %c1_i32_0, %c1_i32 : i32
    %2 = arith.remsi %arg1, %1 : i32
    %c0_i32_1 = arith.constant 0 : i32
    %3 = arith.cmpi ne, %2, %c0_i32_1 : i32
    %c0_i32_2 = arith.constant 0 : i32
    %4 = arith.cmpi slt, %2, %c0_i32_2 : i32
    %c0_i32_3 = arith.constant 0 : i32
    %5 = arith.cmpi slt, %1, %c0_i32_3 : i32
    %6 = arith.xori %4, %5 : i1
    %7 = arith.andi %6, %3 : i1
    %8 = arith.addi %2, %1 : i32
    %9 = arith.select %7, %8, %2 : i32
    %c0_i32_4 = arith.constant 0 : i32
    %c0_i32_5 = arith.constant 0 : i32
    return %9, %c0_i32_4 : i32, i32
  }
  func.func @transform_4(%arg0: i32, %arg1: i32, %arg2: i32) -> (i32, i32, i32) {
    %c0_i32 = arith.constant 0 : i32
    %c0_i32_0 = arith.constant 0 : i32
    return %arg0, %arg1, %c0_i32 : i32, i32, i32
  }
}

</mosaic_0001>

<bundles_post_ra>
// kernel: tpu_custom_call.1
= control target key start
LH: loop header
LB: loop body
LE: loop exit
PB: predicated region body
PF: predicated region fallthrough
CT: control target
= control target key end

     0   :  { %9 = vsyncpa [#allocation4], 0  ;;  %s1424_s0 = inlined_call_operand.hbm [shape: bf16[16,32], index: 0, kind: input, shape index: {}]   ;;  %s1425_s1 = inlined_call_operand.hbm [shape: bf16[32,64], index: 1, kind: input, shape index: {}]   ;;  %s1426_s2 = inlined_call_operand.hbm [shape: f32[8,8], index: 2, kind: input, shape index: {}]   ;;  %s1427_s3 = inlined_call_operand.hbm [shape: f32[8,8], index: 3, kind: input, shape index: {}]   ;;  %s1428_s4 = inlined_call_operand.vmem [shape: bf16[8,16,8], index: 4, kind: output, shape index: {}]  }
   0x1   :  { %11 = vsyncpa [#allocation4 + $0x1], 0 }
   0x2   :  { %12 = vsyncpa [#allocation6], 0 }
   0x3   :  { %13 = vsyncpa [#allocation9], 0  ;;  %s1204_s15 = smov 0   ;;  %s1206_s16 = smov 0  }
   0x4   :  { %s1208_s17 = smov 0   ;;  %s1210_s18 = smov 0  }
   0x5   :  { %s1212_s19 = smov 0   ;;  %s1214_s20 = smov 0  }
   0x6 LB: > { %s829_s21 = sadd.s32 4294967295, %s1152_s20   ;;  %p831_p0 = scmp.ge.s32.totalorder %s1152_s20, 1  ;;  %s1152_s20 = sphi %s1214_s20, %s19_s20   ;;  %s1148_s19 = sphi %s1212_s19, %s1439_s19   ;;  %s1144_s18 = sphi %s1210_s18, %s1438_s18   ;;  %s1140_s17 = sphi %s1208_s17, %s1437_s17   ;;  %s1136_s16 = sphi %s1206_s16, %s1436_s16   ;;  %s1132_s15 = sphi %s1204_s15, %s1435_s15  }
   0x7   : > { %p1238_p1 = scmp.eq.s32.totalorder %s829_s21, 0  ;;  %p169_p2 = scmp.lt.s32.totalorder %s1152_s20, 3 }
   0x8   : > { %s184_s25 = sshll.u32 %s1425_s1, 4  ;;  %s1154_s27 = smov [#allocation5]   ;;  %s185_s25 = int_to_ptr.hbm [resolvable:$true] %s184_s25 }
   0x9   : > { %p1246_p3 = pnand %p831_p0, %p169_p2  ;;  %s186_s28 = sshll.u32 %s1154_s27, 4  ;;  %s187_s28 = int_to_ptr.vmem [resolvable:$true] %s186_s28 }
   0xa   : > { %s199_s6 = sshll.u32 %s1426_s2, 4  ;;  %s1155_s7 = smov 64   ;;  %s200_s6 = int_to_ptr.hbm [resolvable:$true] %s199_s6 }
   0xb   : > { %p880_p4 = pneg %p1246_p3  ;;  %s1156_s8 = smov 4  }
   0xc   : > { %s1157_s9 = smov [#allocation7]   ;;  %s211_s13 = sshll.u32 %s1427_s3, 4  ;;  %s212_s13 = int_to_ptr.hbm [resolvable:$true] %s211_s13 }
   0xd   : > { %p1254_p5 = pnand %p880_p4, %p1238_p1  ;;  %s201_s10 = sshll.u32 %s1157_s9, 4  ;;  %s202_s10 = int_to_ptr.vmem [resolvable:$true] %s201_s10 }
   0xe   : > { %s1158_s14 = smov [#allocation8]   ;;  %s34_s24 = sadd.s32 1, %s1148_s19 }
   0xf   : > { %883 = dma.hbm_to_vmem [thread:$0]  (!%p1254_p5), %s185_s25, 256, %s187_s28, [#allocation6], %s1155_s7, %s1155_s7, %s1156_s8  }
  0x10   : > { %886 = dma.hbm_to_vmem [thread:$0]  (!%p1254_p5), %s200_s6, 128, %s202_s10, [#allocation6]  }
  0x11   : > { %s213_s23 = sshll.u32 %s1158_s14, 4  ;;  %p36_p6 = scmp.ge.s32.totalorder %s34_s24, 2  ;;  %s214_s23 = int_to_ptr.vmem [resolvable:$true] %s213_s23 }
  0x12   : > { %889 = dma.hbm_to_vmem [thread:$0]  (!%p1254_p5), %s212_s13, 128, %s214_s23, [#allocation9]  }
  0x13   : > { %p54_p7 = scmp.ne.s32.totalorder %s1140_s17, %s1136_s16  ;;  %p55_p8 = scmp.eq.s32.totalorder %s1152_s20, 0 }
  0x14   : > { %s1441_s24 = smov (%p36_p6, %s34_s24), 0  ;;  %s47_s25 = sadd.s32 1, %s1140_s17 }
  0x15   : > { %p60_p9 = scmp.ne.s32.totalorder %s1136_s16, %s1132_s15  ;;  %s42_s27 = ssub.s32 %s1148_s19, %s1441_s24 }
  0x16   : > { %p156_p10 = scmp.eq.s32.totalorder %s829_s21, 1  ;;  %p45_p11 = scmp.eq.s32.totalorder %s42_s27, 0 }
  0x17   : > { %p1285_p12 = por %p1238_p1, %p60_p9  ;;  %p1289_p13 = por %p55_p8, %p54_p7 }
  0x18   : > { %p1293_p0 = por %p156_p10, %p54_p7  ;;  %s224_s15 = sand.u32 1, %s1140_s17  }
  0x19   : > { %s1298_s5 = scalar_select %p45_p11, %s1140_s17, %s47_s25  }
  0x1a   : > { %s837_s6 = sshll.u32 %s1148_s19, 2  ;;  %p897_p2 = scmp.lt.s32.totalorder %s1152_s20, 2 }
  0x1b   : > { %s836_s21 = sshll.u32 %s224_s15, 2  ;;  %s233_s9 = scalar_lea.hbm %s1424_s0, %s837_s6 }
  0x1c   : > { %s235_s10 = sshll.u32 %s233_s9, 4  ;;  %s228_s11 = scalar_lea.vmem [#allocation3], %s836_s21  ;;  %s236_s10 = int_to_ptr.hbm [resolvable:$true] %s235_s10 }
  0x1d   : > { %s237_s12 = sshll.u32 %s228_s11, 4  ;;  %p891_p4 = pnand %p897_p2, %p1289_p13  ;;  %s238_s12 = int_to_ptr.vmem [resolvable:$true] %s237_s12 }
  0x1e   : > { %s225_s13 = scalar_lea.sflag [#allocation4], %s224_s15  ;;  %246 = sbr.rel (%p1246_p3) target bundleno = 578 (0x242), region = 36 }
  0x1f   : > { %893 = dma.hbm_to_vmem [thread:$0]  (!%p891_p4), %s236_s10, 64, %s238_s12, %s225_s13  }
  0x20   : > { %s1311_s14 = sand.u32 (!%p1246_p3), 1, %s1136_s16  }
  0x21   : > { %s839_s23 = sshll.u32 (!%p1246_p3), %s1311_s14, 2  ;;  %s249_s25 = scalar_lea.sflag (!%p1246_p3), [#allocation4], %s1311_s14 }
  0x22   : > { %s252_s27 = scalar_lea.vmem (!%p1246_p3), [#allocation3], %s839_s23 }
  0x23   : > { %1119 = dma.done.wait (%p1285_p12), %s249_s25, 64  }
  0x24   : > { %1121 = vsyncadd (%p1285_p12), %s249_s25, 4294967232 }
  0x25   : > { %1123 = dma.done.wait (%p1238_p1), [#allocation6], 384  }
  0x26   : > { %1125 = vsyncadd (%p1238_p1), [#allocation6], 4294966912 }
  0x27   : > { %1127 = dma.done.wait (%p1238_p1), [#allocation9], 128  }
  0x28   : > { %1129 = vsyncadd (%p1238_p1), [#allocation9], 4294967168  ;;  %vm299_vm0 = vcmask 523264   ;;  %v1159_v0 = vmov 0.0   ;;  %v865_v1 = vld [vmem:[#allocation5 + $0x8] sm:$0xff]  ;;  %v864_v2 = vld [vmem:[#allocation5] sm:$0xff] }
  0x29   : > { %300 = vst.msk [vmem:[#allocation2] sm:$0xff] %vm299_vm0, %v1159_v0  ;;  %329 = vmatpush.bf16.msra.mxu0 %v865_v1  ;;  %v302_v3 = vld [vmem:[%s252_s27] sm:$0xf]  ;;  %vm319_vm1 = vcmask 261120   ;;  %s1160_s26 = smov 100   ;;  %s1161_s22 = smov 108  }
  0x2a   : > { %s1162_s28 = smov 116   ;;  %s1163_s29 = smov 124   ;;  %v1339_v9 = vld [vmem:[#allocation7] sm:$0xff]  ;;  %vm354_vm2 = vcmask 31744   ;;  %v1346_v11 = vld [vmem:[#allocation8] sm:$0xff]  ;;  %vm370_vm3 = vcmask 60416  }
  0x2b   : > { %s1164_s15 = smov 84   ;;  %s1165_s6 = smov 92  }
  0x2c   : > { %s1166_s21 = smov 16   ;;  %s1167_s7 = smov 8  }
  0x2d   : > { %330 = vmatpush.bf16.msra.mxu0 %v864_v2  ;;  %s1168_s8 = smov 32   ;;  %s1169_s9 = smov 24  }
  0x2e   : > { %s1170_s10 = smov 40   ;;  %s1171_s11 = smov 4  }
  0x2f   : > { %s1172_s12 = smov 104   ;;  %s1173_s13 = smov 112  }
  0x30   : > { %852 = vmatmul.msk.bf16.vlgmr.msra.gmra.mxu0 %vm319_vm1, %v302_v3  ;;  %v301_v4 = vld [vmem:[#allocation2] sm:$0xff]  ;;  %s1174_s23 = smov 80   ;;  %s1175_s25 = smov 96  }
  0x31   : > { %s843_s27 = sshll.u32 %s1311_s14, 5  ;;  %s1178_s14 = smov 72  }
  0xad   : > { %v332_v5 = vpop.f32.mrf.mxu0 }
  0xae   : > { %v336_v6 = vadd.f32 %v332_v5, %v301_v4 }
  0xb0   : > { %338 = vst.msk [vmem:[#allocation2] sm:$0xff] %vm299_vm0, %v336_v6 }
  0xb5   : > { %v334_v7 = vpop.f32.mrf.mxu0 }
  0xb7   : > { %v1327_v8 = vld [vmem:[#allocation2] sm:$0xff] }
  0xb8   : > { %456 = vrot.lane.b32.xlu2 %v1327_v8, %s1160_s26  ;;  %418 = vrot.lane.b32.xlu1 %v1327_v8, %s1161_s22  ;;  %v594_v43 = vpack.c.bf16 %v1327_v8, %v1327_v8  ;;  %v346_v61 = vmul.f32 %v1327_v8, %v1339_v9 }
  0xb9   : > { %380 = vrot.lane.b32.xlu0 %v1327_v8, %s1162_s28 }
  0xc0   : > { %459 = vrot.lane.b32.xlu2 %v1327_v8, %s1161_s22  ;;  %421 = vrot.lane.b32.xlu1 %v1327_v8, %s1162_s28  ;;  %s1177_s22 = smov 88   ;;  %s1374_s28 = scalar_lea.vmem [#allocation10], %s843_s27 }
  0xc1   : > { %383 = vrot.lane.b32.xlu0 %v1327_v8, %s1163_s29 }
  0xc8   : > { %532 = vrot.lane.b32.xlu2 %v1327_v8, %s1164_s15  ;;  %497 = vrot.lane.b32.xlu1 %v1327_v8, %s1160_s26  ;;  %s1176_s26 = smov 120  }
  0xc9   : > { %494 = vrot.lane.b32.xlu0 %v1327_v8, %s1165_s6 }
  0xd0   : > { %413 = vrot.lane.b32.xlu2 %v1339_v9, %s1166_s21  ;;  %375 = vrot.lane.b32.xlu1 %v1339_v9, %s1167_s7 }
  0xd1   : > { %535 = vrot.lane.b32.xlu0 %v1327_v8, %s1165_s6 }
  0xd8   : > { %489 = vrot.lane.b32.xlu1 %v1339_v9, %s1168_s8 }
  0xd9   : > { %451 = vrot.lane.b32.xlu0 %v1339_v9, %s1169_s9 }
 0x112   : > { %v457_v10 = vpop.permute.xlu2 %456 }
 0x11a   : > { %v460_v12 = vpop.permute.xlu2 %459 }
 0x11b   : > { %v462_v13 = vsel %vm354_vm2, %v457_v10, %v460_v12 }
 0x11c   : > { %v463_v14 = vmul.f32 %v462_v13, %v1346_v11 }
 0x11e   : > { %465 = vrot.lane.b32.xlu0 %v463_v14, %s1169_s9 }
 0x122   : > { %v533_v27 = vpop.permute.xlu2 %532 }
 0x12a   : > { %v419_v15 = vpop.permute.xlu1 %418  ;;  %v414_v31 = vpop.permute.xlu2 %413 }
 0x12b   : > { %v381_v16 = vpop.permute.xlu0 %380  ;;  %v416_v33 = vmul.f32 %v1327_v8, %v414_v31 }
 0x132   : > { %v422_v17 = vpop.permute.xlu1 %421 }
 0x133   : > { %v424_v18 = vsel %vm354_vm2, %v419_v15, %v422_v17  ;;  %v384_v19 = vpop.permute.xlu0 %383 }
 0x134   : > { %v425_v20 = vmul.f32 %v424_v18, %v1346_v11  ;;  %v386_v21 = vsel %vm354_vm2, %v381_v16, %v384_v19 }
 0x135   : > { %v387_v22 = vmul.f32 %v386_v21, %v1346_v11 }
 0x136   : > { %427 = vrot.lane.b32.xlu2 %v425_v20, %s1166_s21 }
 0x137   : > { %389 = vrot.lane.b32.xlu1 %v387_v22, %s1167_s7 }
 0x13a   : > { %v498_v23 = vpop.permute.xlu1 %497 }
 0x13b   : > { %v495_v24 = vpop.permute.xlu0 %494 }
 0x13c   : > { %v500_v25 = vsel %vm354_vm2, %v495_v24, %v498_v23 }
 0x13d   : > { %v501_v26 = vmul.f32 %v500_v25, %v1346_v11 }
 0x13e   : > { %527 = vrot.lane.b32.xlu2 %v1339_v9, %s1170_s10 }
 0x13f   : > { %503 = vrot.lane.b32.xlu0 %v501_v26, %s1168_s8 }
 0x142   : > { %v376_v44 = vpop.permute.xlu1 %375 }
 0x143   : > { %v536_v28 = vpop.permute.xlu0 %535  ;;  %v378_v50 = vmul.f32 %v1327_v8, %v376_v44 }
 0x144   : > { %v538_v29 = vsel %vm354_vm2, %v533_v27, %v536_v28 }
 0x145   : > { %v539_v30 = vmul.f32 %v538_v29, %v1346_v11 }
 0x146   : > { %348 = vrot.lane.b32.xlu2 %v1327_v8, %s1163_s29  ;;  %s861_s29 = sshll.u32 (%p1293_p0), %s1144_s18, 2 }
 0x147   : > { %541 = vrot.lane.b32.xlu1 %v539_v30, %s1170_s10  ;;  %351 = vrot.lane.b32.xlu0 %v1327_v8, %s1171_s11  ;;  %s650_s21 = scalar_lea.vmem (%p1293_p0), %s1428_s4, %s861_s29 }
 0x14a   : > { %v490_v45 = vpop.permute.xlu1 %489 }
 0x14b   : > { %v452_v32 = vpop.permute.xlu0 %451  ;;  %v492_v47 = vmul.f32 %v490_v45, %v1327_v8 }
 0x14c   : > { %v454_v34 = vmul.f32 %v452_v32, %v1327_v8 }
 0x190   : > { %v428_v35 = vpop.permute.xlu2 %427  ;;  %v466_v36 = vpop.permute.xlu0 %465 }
 0x191   : > { %v430_v37 = vadd.f32 %v428_v35, %v416_v33  ;;  %v468_v38 = vadd.f32 %v466_v36, %v454_v34 }
 0x193   : > { %v437_v39 = vmul.f32 0.35355338, %v430_v37  ;;  %v475_v40 = vmul.f32 0.35355338, %v468_v38 }
 0x195   : > { %v442_v41 = vpack.c.bf16 %v437_v39, %v437_v39  ;;  %v480_v42 = vpack.c.bf16 %v475_v40, %v475_v40 }
 0x197   : > { %482 = vrot.lane.b32.xlu0 %v480_v42, %s1172_s12  ;;  %444 = vrot.lane.b32.xlu2 %v442_v41, %s1173_s13 }
 0x198   : > { %v528_v46 = vpop.permute.xlu2 %527 }
 0x199   : > { %v530_v54 = vmul.f32 %v528_v46, %v1327_v8 }
 0x19f   : > { %596 = vrot.lane.b32.xlu0 %v594_v43, %s1174_s23 }
 0x1a0   : > { %v349_v55 = vpop.permute.xlu2 %348 }
 0x1a9   : > { %v390_v48 = vpop.permute.xlu1 %389 }
 0x1aa   : > { %v392_v52 = vadd.f32 %v390_v48, %v378_v50 }
 0x1ac   : > { %v399_v56 = vmul.f32 0.35355338, %v392_v52 }
 0x1ae   : > { %v404_v63 = vpack.c.bf16 %v399_v56, %v399_v56 }
 0x1b1   : > { %v504_v49 = vpop.permute.xlu0 %503 }
 0x1b2   : > { %v506_v51 = vadd.f32 %v504_v49, %v492_v47 }
 0x1b4   : > { %v518_v53 = vpack.c.bf16 %v506_v51, %v506_v51 }
 0x1b6   : > { %520 = vrot.lane.b32.xlu1 %v518_v53, %s1175_s25 }
 0x1b9   : > { %v542_v57 = vpop.permute.xlu1 %541  ;;  %v352_v58 = vpop.permute.xlu0 %351 }
 0x1ba   : > { %v544_v59 = vadd.f32 %v542_v57, %v530_v54  ;;  %v355_v60 = vsel %vm354_vm2, %v349_v55, %v352_v58 }
 0x1bb   : > { %v356_v62 = vmul.f32 %v355_v60, %v1346_v11 }
 0x1bc   : > { %v556_v0 = vpack.c.bf16 %v544_v59, %v544_v59 }
 0x1bd   : > { %v357_v1 = vadd.f32 %v356_v62, %v346_v61 }
 0x1be   : > { %406 = vrot.lane.b32.xlu1 %v404_v63, %s1176_s26  ;;  %558 = vrot.lane.b32.xlu2 %v556_v0, %s1177_s22 }
 0x1bf   : > { %v364_v2 = vmul.f32 0.35355338, %v357_v1 }
 0x1c1   : > { %v369_v3 = vpack.c.bf16 %v364_v2, %v364_v2 }
 0x1c3   : > { %371 = vst.msk [vmem:[%s1374_s28] sm:$0xf] %vm370_vm3, %v369_v3 }
 0x1c6   : > { %634 = vrot.lane.b32.xlu1 %v594_v43, %s1178_s14 }
 0x1ca   : > { %v667_v11 = vld [vmem:[%s1374_s28] sm:$0xf] (%p1293_p0) }
 0x1cb   : > { %668 = vst [vmem:[%s650_s21] sm:$0xf] (%p1293_p0), %v667_v11 }
 0x1f1   : > { %v445_v4 = vpop.permute.xlu2 %444 }
 0x1f2   : > { %854 = vst.msk [vmem:[%s1374_s28 + $0x8] sm:$0xf] %vm370_vm3, %v445_v4 }
 0x1f9   : > { %v671_v13 = vld [vmem:[%s1374_s28 + $0x8] sm:$0xf] (%p1293_p0) }
 0x1fa   : > { %672 = vst [vmem:[%s650_s21 + $0x10] sm:$0xf] (%p1293_p0), %v671_v13 }
 0x209   : > { %v483_v5 = vpop.permute.xlu0 %482 }
 0x20a   : > { %855 = vst.msk [vmem:[%s1374_s28 + $0xc] sm:$0xf] %vm370_vm3, %v483_v5 }
 0x211   : > { %v597_v6 = vpop.permute.xlu0 %596  ;;  %v673_v14 = vld [vmem:[%s1374_s28 + $0xc] sm:$0xf] (%p1293_p0) }
 0x212   : > { %858 = vst.msk [vmem:[%s1374_s28 + $0x18] sm:$0xf] %vm370_vm3, %v597_v6 }
 0x213   : > { %674 = vst [vmem:[%s650_s21 + $0x18] sm:$0xf] (%p1293_p0), %v673_v14 }
 0x218   : > { %v559_v7 = vpop.permute.xlu2 %558 }
 0x219   : > { %857 = vst.msk [vmem:[%s1374_s28 + $0x14] sm:$0xf] %vm370_vm3, %v559_v7  ;;  %v679_v17 = vld [vmem:[%s1374_s28 + $0x18] sm:$0xf] (%p1293_p0) }
 0x21a   : > { %680 = vst [vmem:[%s650_s21 + $0x30] sm:$0xf] (%p1293_p0), %v679_v17 }
 0x220   : > { %v677_v16 = vld [vmem:[%s1374_s28 + $0x14] sm:$0xf] (%p1293_p0) }
 0x221   : > { %678 = vst [vmem:[%s650_s21 + $0x28] sm:$0xf] (%p1293_p0), %v677_v16 }
 0x228   : > { %v521_v8 = vpop.permute.xlu1 %520 }
 0x229   : > { %856 = vst.msk [vmem:[%s1374_s28 + $0x10] sm:$0xf] %vm370_vm3, %v521_v8 }
 0x230   : > { %v407_v9 = vpop.permute.xlu1 %406  ;;  %v675_v15 = vld [vmem:[%s1374_s28 + $0x10] sm:$0xf] (%p1293_p0) }
 0x231   : > { %853 = vst.msk [vmem:[%s1374_s28 + $0x4] sm:$0xf] %vm370_vm3, %v407_v9 }
 0x232   : > { %676 = vst [vmem:[%s650_s21 + $0x20] sm:$0xf] (%p1293_p0), %v675_v15 }
 0x235   : > { %645 = sbr.rel (!%p1293_p0) target bundleno = 578 (0x242), region = 64 }
 0x238   : > { %v635_v10 = vpop.permute.xlu1 %634  ;;  %v669_v12 = vld [vmem:[%s1374_s28 + $0x4] sm:$0xf] (%p1293_p0) }
 0x239   : > { %859 = vst.msk [vmem:[%s1374_s28 + $0x1c] sm:$0xf] %vm370_vm3, %v635_v10 }
 0x23a   : > { %670 = vst [vmem:[%s650_s21 + $0x8] sm:$0xf] %v669_v12 }
 0x240   : > { %v681_v18 = vld [vmem:[%s1374_s28 + $0x1c] sm:$0xf] }
 0x241   : > { %682 = vst [vmem:[%s650_s21 + $0x38] sm:$0xf] %v681_v18 }
 0x242 PF: > { %s19_s20 = sadd.s32 1, %s1152_s20   ;;  %s1435_s15 = smov %s1136_s16 }
 0x243   : > { %p16_p1 = scmp.ge.s32.totalorder %s19_s20, 4   ;;  %s1436_s16 = smov %s1140_s17 }
 0x244   : > { %s1437_s17 = smov %s1298_s5  ;;  %s1438_s18 = smov %s1148_s19 }
 0x245   : > { %s1439_s19 = smov %s1441_s24  ;;  %18 = sbr.rel (!%p16_p1) target bundleno = 6 (0x6), region = 145 }
 0x24a   :  { %732 = vsyncpa [#allocation4], 1 }
 0x24b   :  { %734 = vsyncpa [#allocation4 + $0x1], 1 }
 0x24c   :  { %735 = vsyncpa [#allocation6], 1 }
 0x24d   :  { %736 = vsyncpa [#allocation9], 1 }

</bundles_post_ra>
